<compile_context>
chip_gen: v7x
topology: tpu7x:2x2x1
jax: 0.10.0
libtpu: 0.0.40
codegen_flags: <defaults>
</compile_context>

<pallas_src>
import functools

import jax
import jax.numpy as jnp
from jax.experimental import pallas as pl
from jax.experimental.pallas import tpu as pltpu


def _round_up(x, m):
    return ((x + m - 1) // m) * m


def _vmem_capacity_bytes():
    """Per-generation VMEM capacity (128 MiB v5e/v6e, 64 MiB per-TC v7x)."""
    try:
        cap = getattr(pltpu.get_tpu_info(), "vmem_capacity_bytes", None)
        if cap:
            return int(cap)
    except Exception:
        pass
    return 64 * 1024 * 1024  # conservative (v7x per-TensorCore)


def encoder_kernel(x_ref, w_ref, b_ref, eps_ref, out_ref, *, latent, l_pad):
    # In-kernel bf16 cast (VPU; hides under MXU/DMA slots) -> x ships once as-is.
    x = x_ref[...].astype(jnp.bfloat16)
    # One fused MXU matmul over the concatenated [d_in, 2*l_pad] weight,
    # f32 accumulation, f32 bias add.
    z = jnp.dot(x, w_ref[...], preferred_element_type=jnp.float32) + b_ref[...]
    # Split offsets 0 and l_pad are multiples of 128 -> lane-aligned selection.
    mu = z[:, :latent]
    log_var = z[:, l_pad:l_pad + latent]
    std = jnp.exp(0.5 * log_var)                    # EUP
    eps = eps_ref[...].astype(jnp.float32)
    out_ref[...] = (mu + std * eps).astype(out_ref.dtype)


@functools.partial(jax.jit, static_argnames=("block_m",))
def encoder_forward(x, w, b, eps, *, block_m=1024):
    """x: [B, d_in], w: [d_in, 2L], b: [2L], eps: [B, L] -> z: [B, L] (f32)."""
    B, d_in = x.shape
    two_l = w.shape[1]
    latent = two_l // 2

    # ---- one-time weight layout plumbing (O(d_in*latent), typically constant) --
    # Split into mu / log_var halves, pad each half's output axis to a multiple
    # of 128 lanes, re-concatenate -> a single fused matmul whose split point is
    # lane-aligned inside the kernel.
    l_pad = _round_up(latent, 128)
    pad = l_pad - latent
    w_mu, w_lv = w[:, :latent], w[:, latent:]
    b_mu, b_lv = b[:latent], b[latent:]
    if pad:
        w_mu = jnp.pad(w_mu, ((0, 0), (0, pad)))
        w_lv = jnp.pad(w_lv, ((0, 0), (0, pad)))
        b_mu = jnp.pad(b_mu, (0, pad))
        b_lv = jnp.pad(b_lv, (0, pad))
    w_cat = jnp.concatenate([w_mu, w_lv], axis=1).astype(jnp.bfloat16)  # [d_in, 2*l_pad]
    b_cat = jnp.concatenate([b_mu, b_lv]).reshape(1, 2 * l_pad).astype(jnp.float32)

    # ---- per-generation VMEM budget & batch tile --------------------------------
    vmem_cap = _vmem_capacity_bytes()
    budget = max(vmem_cap - 24 * 1024 * 1024, 16 * 1024 * 1024)   # Mosaic headroom
    # Resident W/b are still double-buffered by default -> counted exactly 2x
    # (no additional safety multiplier on top).
    fixed_bytes = 2 * (w_cat.size * 2 + b_cat.size * 4)
    per_row = 2 * (d_in * x.dtype.itemsize        # x tile (double-buffered)
                   + latent * eps.dtype.itemsize  # eps tile
                   + latent * 4)                  # out tile
    tm_budget = max(16, int((budget - fixed_bytes) // per_row))

    if B <= 16:
        tm = B                                    # full-dim block, always layout-legal
    else:
        # >= 2 grid steps so the "parallel" batch axis shards over v7x's 2 TCs;
        # 16-sublane aligned for the packed bf16 x tile.
        tm = min(block_m, tm_budget, _round_up(pl.cdiv(B, 2), 16))
        tm = max(16, (tm // 16) * 16)
    grid = (pl.cdiv(B, tm),)

    est = fixed_bytes + per_row * tm
    vmem_limit = int(min(vmem_cap - 8 * 1024 * 1024,
                         max(est + 16 * 1024 * 1024, 32 * 1024 * 1024)))

    cost = pl.CostEstimate(
        flops=2 * B * d_in * (2 * l_pad),
        transcendentals=B * latent,
        bytes_accessed=(x.size * x.dtype.itemsize
                        + w_cat.size * 2
                        + b_cat.size * 4
                        + eps.size * eps.dtype.itemsize
                        + B * latent * 4),
    )

    kernel = functools.partial(encoder_kernel, latent=latent, l_pad=l_pad)

    return pl.pallas_call(
        kernel,
        out_shape=jax.ShapeDtypeStruct((B, latent), jnp.float32),
        grid=grid,
        in_specs=[
            pl.BlockSpec((tm, d_in), lambda i: (i, 0)),          # x   : batch-tiled
            pl.BlockSpec((d_in, 2 * l_pad), lambda i: (0, 0)),   # W   : resident
            pl.BlockSpec((1, 2 * l_pad), lambda i: (0, 0)),      # b   : resident
            pl.BlockSpec((tm, latent), lambda i: (i, 0)),        # eps : batch-tiled
        ],
        out_specs=pl.BlockSpec((tm, latent), lambda i: (i, 0)),
        compiler_params=pltpu.CompilerParams(
            dimension_semantics=("parallel",),    # megacore sharding on v7x
            vmem_limit_bytes=vmem_limit,
        ),
        cost_estimate=cost,
    )(x, w_cat, b_cat, eps)


if __name__ == "__main__":
    B, D_IN, LATENT = 8, 32, 16

    key = jax.random.PRNGKey(0)
    k_x, k_w, k_b, k_eps = jax.random.split(key, 4)

    bound = 1.0 / (D_IN ** 0.5)
    x = jax.random.normal(k_x, (B, D_IN), dtype=jnp.float32)
    w = jax.random.uniform(k_w, (D_IN, 2 * LATENT), minval=-bound, maxval=bound,
                           dtype=jnp.float32)
    b = jax.random.uniform(k_b, (2 * LATENT,), minval=-bound, maxval=bound,
                           dtype=jnp.float32)
    # eps ~ Normal(0, 1), drawn directly in bf16 (no extra convert pass, half the
    # HBM read); fixed key -> deterministic reference check.
    eps = jax.random.normal(k_eps, (B, LATENT), dtype=jnp.bfloat16)

    out = encoder_forward(x, w, b, eps)
    jax.block_until_ready(out)

    # Pure-JAX reference of the same math with the same bf16-rounded MXU inputs,
    # f32 accumulation, and f32 reparameterization epilogue.
    xb = x.astype(jnp.bfloat16).astype(jnp.float32)
    wb = w.astype(jnp.bfloat16).astype(jnp.float32)
    z_ref = jnp.dot(xb, wb, precision=jax.lax.Precision.HIGHEST) + b
    mu_ref, lv_ref = z_ref[:, :LATENT], z_ref[:, LATENT:]
    ref = mu_ref + jnp.exp(0.5 * lv_ref) * eps.astype(jnp.float32)

    assert out.shape == (B, LATENT)
    assert jnp.allclose(out, ref, atol=1e-4, rtol=1e-4), (
        f"max abs err {jnp.max(jnp.abs(out - ref))}")

    print("KERNEL_OK")
</pallas_src>

<mosaic_0001>
module attributes {stable_mosaic.version = 11 : i64} {
  func.func @encoder_kernel(%arg0: i32, %arg1: memref<8x32xf32, #tpu.memory_space<vmem>>, %arg2: memref<32x256xbf16, #tpu.memory_space<vmem>>, %arg3: memref<1x256xf32, #tpu.memory_space<vmem>>, %arg4: memref<8x16xbf16, #tpu.memory_space<vmem>>, %arg5: memref<8x16xf32, #tpu.memory_space<vmem>>) attributes {dimension_semantics = [#tpu.dimension_semantics<parallel>], iteration_bounds = array<i64: 1>, scalar_prefetch = 0 : i64, scratch_operands = 0 : i64, tpu.core_type = #tpu.core_type<tc>, window_params = [{transform_indices = @transform_0, window_bounds = array<i64: 8, 32>}, {pipeline_mode = #tpu.pipeline_mode<synchronous>, transform_indices = @transform_1, window_bounds = array<i64: 32, 256>}, {pipeline_mode = #tpu.pipeline_mode<synchronous>, transform_indices = @transform_2, window_bounds = array<i64: 1, 256>}, {transform_indices = @transform_3, window_bounds = array<i64: 8, 16>}, {transform_indices = @transform_4, window_bounds = array<i64: 8, 16>}]} {
    %c0 = arith.constant 0 : index
    %c0_0 = arith.constant 0 : index
    %0 = vector.load %arg1[%c0, %c0_0] : memref<8x32xf32, #tpu.memory_space<vmem>>, vector<8x32xf32>
    %1 = arith.truncf %0 : vector<8x32xf32> to vector<8x32xbf16>
    %c0_1 = arith.constant 0 : index
    %c0_2 = arith.constant 0 : index
    %2 = vector.load %arg2[%c0_1, %c0_2] : memref<32x256xbf16, #tpu.memory_space<vmem>>, vector<32x256xbf16>
    %cst = arith.constant dense<0.000000e+00> : vector<8x256xf32>
    %3 = tpu.matmul %1, %2, %cst {dimension_numbers = #tpu.dot_dimension_numbers<[1], [0], [0], [1], [0, 0, 1, 1], [], []>} : vector<8x32xbf16>, vector<32x256xbf16>, vector<8x256xf32> -> vector<8x256xf32>
    %c0_3 = arith.constant 0 : index
    %c0_4 = arith.constant 0 : index
    %4 = vector.load %arg3[%c0_3, %c0_4] : memref<1x256xf32, #tpu.memory_space<vmem>>, vector<1x256xf32>
    %5 = vector.broadcast %4 : vector<1x256xf32> to vector<8x256xf32>
    %6 = arith.addf %3, %5 : vector<8x256xf32>
    %7 = vector.extract_strided_slice %6 {offsets = [0, 0], sizes = [8, 16], strides = [1, 1]} : vector<8x256xf32> to vector<8x16xf32>
    %8 = vector.extract_strided_slice %6 {offsets = [0, 128], sizes = [8, 16], strides = [1, 1]} : vector<8x256xf32> to vector<8x16xf32>
    %cst_5 = arith.constant 5.000000e-01 : f32
    %9 = vector.broadcast %cst_5 : f32 to vector<8x16xf32>
    %10 = arith.mulf %9, %8 : vector<8x16xf32>
    %11 = math.exp %10 : vector<8x16xf32>
    %c0_6 = arith.constant 0 : index
    %c0_7 = arith.constant 0 : index
    %12 = vector.load %arg4[%c0_6, %c0_7] : memref<8x16xbf16, #tpu.memory_space<vmem>>, vector<8x16xbf16>
    %13 = arith.extf %12 : vector<8x16xbf16> to vector<8x16xf32>
    %14 = arith.mulf %11, %13 : vector<8x16xf32>
    %15 = arith.addf %7, %14 : vector<8x16xf32>
    %c0_8 = arith.constant 0 : index
    %c0_9 = arith.constant 0 : index
    %16 = vector.load %arg5[%c0_8, %c0_9] : memref<8x16xf32, #tpu.memory_space<vmem>>, vector<8x16xf32>
    tpu.vector_store %arg5[%c0_8, %c0_9], %15 {strides = array<i32>} : memref<8x16xf32, #tpu.memory_space<vmem>>, vector<8x16xf32>,
    return
  }
  func.func @transform_0(%arg0: i32) -> (i32, i32) {
    %c0_i32 = arith.constant 0 : i32
    %c0_i32_0 = arith.constant 0 : i32
    return %arg0, %c0_i32 : i32, i32
  }
  func.func @transform_1(%arg0: i32) -> (i32, i32) {
    %c0_i32 = arith.constant 0 : i32
    %c0_i32_0 = arith.constant 0 : i32
    %c0_i32_1 = arith.constant 0 : i32
    return %c0_i32, %c0_i32_0 : i32, i32
  }
  func.func @transform_2(%arg0: i32) -> (i32, i32) {
    %c0_i32 = arith.constant 0 : i32
    %c0_i32_0 = arith.constant 0 : i32
    %c0_i32_1 = arith.constant 0 : i32
    return %c0_i32, %c0_i32_0 : i32, i32
  }
  func.func @transform_3(%arg0: i32) -> (i32, i32) {
    %c0_i32 = arith.constant 0 : i32
    %c0_i32_0 = arith.constant 0 : i32
    return %arg0, %c0_i32 : i32, i32
  }
  func.func @transform_4(%arg0: i32) -> (i32, i32) {
    %c0_i32 = arith.constant 0 : i32
    %c0_i32_0 = arith.constant 0 : i32
    return %arg0, %c0_i32 : i32, i32
  }
}

</mosaic_0001>

<bundles_post_ra>
// kernel: encoder_forward.1
= control target key start
LH: loop header
LB: loop body
LE: loop exit
PB: predicated region body
PF: predicated region fallthrough
CT: control target
= control target key end

     0   :  { %v164_v2 = vmov 0   ;;  %s224_s0 = inlined_call_operand.vmem [shape: f32[8,32], index: 0, kind: input, shape index: {}]   ;;  %s225_s1 = inlined_call_operand.vmem [shape: bf16[32,256], index: 1, kind: input, shape index: {}]   ;;  %s226_s2 = inlined_call_operand.vmem [shape: f32[1,256], index: 2, kind: input, shape index: {}]   ;;  %s227_s3 = inlined_call_operand.vmem [shape: bf16[8,16], index: 3, kind: input, shape index: {}]   ;;  %s228_s4 = inlined_call_operand.hbm [shape: f32[8,16], index: 4, kind: output, shape index: {}]  }
   0x1   :  { %v132_v0 = vld [vmem:[%s225_s1 + $0x4] ss:$8 sps:$4 sm:$0xff]   ;;  %v134_v1 = vld [vmem:[%s225_s1] ss:$8 sps:$4 sm:$0xff]   ;;  %93 = vmatprep.mubr.bf16.mxu0 %v164_v2  ;;  %v135_v3 = vld [vmem:[%s225_s1 + $0x14] ss:$8 sps:$4 sm:$0xff]  }
   0x2   :  { %61 = vmatprep.subr.bf16.mxu0 %v132_v0  ;;  %v137_v4 = vld [vmem:[%s225_s1 + $0x10] ss:$8 sps:$4 sm:$0xff]   ;;  %v19_v5 = vld [vmem:[%s224_s0] sm:$0xff] }
   0x3   :  { %62 = vmatpush1.bf16.msra.mxu0 %v134_v1 }
   0x4   :  { %9 = vsyncpa [#allocation3], 0  ;;  %63 = vmatprep.subr.bf16.mxu0 %v135_v3  ;;  %v20_v6 = vpack.c.bf16 %v19_v5, %v19_v5  ;;  %vm57_vm0 = vcmask 261120   ;;  %v27_v7 = vlaneseq  ;;  %v25_v10 = vld [vmem:[%s226_s2] sm:$0x3]  ;;  %s165_s27 = smov [#allocation2]  }
   0x5   :  { %v105_v20 = vld [vmem:[%s227_s3] sm:$0xf]  ;;  %s117_s28 = sshll.u32 %s165_s27, 4  ;;  %vm109_vm1 = vcmask 130048   ;;  %s118_s28 = int_to_ptr.vmem [resolvable:$true] %s117_s28 }
   0x6   :  { %v28_v8 = vshrl.u32 %v27_v7, 7  ;;  %v106_v22 = vunpack.c.l.bf16 %v105_v20  ;;  %s140_s2 = scalar_lea.vmem %s118_s28, 128  ;;  %p145_p1 = scmp.lt.s32.totalorder %s118_s28, %s118_s28 }
   0x7   :  { %64 = vmatpush1.bf16.msra.mxu0 %v137_v4  ;;  %p141_p0 = scmp.ne.s32.totalorder %s118_s28, %s140_s2  ;;  %p146_p2 = scmp.lt.s32.totalorder %s140_s2, %s140_s2 }
   0x8   :  { %v33_v9 = vsub.s32 1, %v28_v8  ;;  %v29_v19 = vsub.s32 0, %v28_v8 }
   0x9   :  { %p147_p3 = por %p146_p2, %p145_p1 }
   0xa   :  { %129 = vmatmul.mubr.msk.bf16.vlgmr.msra.gmra.mrb[0].mxu0 %vm57_vm0, %v20_v6  ;;  %v34_v11 = vrot.slane %v25_v10, %v33_v9  ;;  %v30_v21 = vrot.slane %v25_v10, %v29_v19 }
   0xb   :  { %p148_p4 = pnand %p147_p3, %p141_p0 }
  0xdd   :  { %v95_v12 = vpop.f32.mrb[0].mxu0 }
  0xde   :  { %v97_v13 = vpop.f32.mrb[1].mxu0  ;;  %v96_v24 = vadd.f32 %v95_v12, %v30_v21 }
  0xdf   :  { %v98_v14 = vadd.f32 %v97_v13, %v34_v11  ;;  %v99_v15 = vpop.f32.mrb[2].mxu0 }
  0xe0   :  { %v100_v16 = vpop.f32.mrb[3].mxu0 }
  0xe1   :  { %v102_v17 = vmul.f32 0.5, %v98_v14 }
  0xe3   :  { %v103_v18 = vmul.f32 1.442695, %v102_v17 }
  0xe5   :  { %138 = vpow2.f32 %v103_v18 }
  0xef   :  { %v139_v23 = vpop.eup %138 }
  0xf0   :  { %v107_v25 = vmul.f32 %v139_v23, %v106_v22 }
  0xf2   :  { %v108_v26 = vadd.f32 %v107_v25, %v96_v24 }
  0xf4   :  { %110 = vst.msk [vmem:[#allocation2] sm:$0xff] %vm109_vm1, %v108_v26 }
  0xf5   :  { %151 = shalt.err (!%p148_p4)
}
  0xf6   :  { %s152_s30 = scalar_lea.hbm %s228_s4, 128 }
  0xf7   :  { %p153_p5 = scmp.ne.s32.totalorder %s228_s4, %s152_s30  ;;  %p156_p6 = scmp.lt.u32.totalorder %s152_s30, %s228_s4 }
  0xf9   :  { %p158_p7 = pnand %p156_p6, %p153_p5 }
  0xfb   :  { %161 = shalt.err (!%p158_p7)
}
  0xfc   :  { %120 = dma.vmem_to_hbm [thread:$0]  %s118_s28, 128, %s228_s4, [#allocation3]  }
  0xfd   :  { %162 = dma.done.wait [#allocation3], 128  }
  0xfe   :  { %163 = vsyncadd [#allocation3], 4294967168 }
  0xff   :  { %124 = vsyncpa [#allocation3], 1 }

</bundles_post_ra>
